<compile_context>
chip_gen: v6e
topology: v6e:2x2x1
jax: 0.10.0
libtpu: 0.0.40
codegen_flags: <defaults>
</compile_context>

<pallas_src>
import math

import jax
import jax.numpy as jnp
from jax import lax
from jax.experimental import pallas as pl
from jax.experimental.pallas import tpu as pltpu


def _round_up(a: int, b: int) -> int:
    return (a + b - 1) // b * b


def _pick_tile(requested: int, padded_dim: int, quantum: int) -> int:
    """Largest multiple of `quantum` <= requested that divides `padded_dim`."""
    t = min(requested, padded_dim)
    t = max((t // quantum) * quantum, quantum)
    while padded_dim % t != 0:
        t -= quantum
    return t


# --------------------------------------------------------------------------- #
# Kernel
# --------------------------------------------------------------------------- #
def _lora_linear_kernel(x_ref, w_ref, xa_ref, b_ref, bias_ref, o_ref, acc_ref):
    """Grid = (M/tm, N/tn, K/tk); K (reduction) is the last grid axis.

    x_ref    : (tm, tk)      activation tile (compute dtype)
    w_ref    : (tn, tk)      frozen weight tile, stored (out, in) -- untransposed
    xa_ref   : (tm, r_pad)   precomputed x @ A^T, f32, j/k-resident
    b_ref    : (tn, r_pad)   LoRA B tile (alpha/r folded in), f32, k-resident
    bias_ref : (1,  tn)      f32
    o_ref    : (tm, tn)
    acc_ref  : (tm, tn)      f32 VMEM scratch -- pretrained-branch accumulator
    """
    k = pl.program_id(2)
    contract_last = (((1,), (1,)), ((), ()))  # contract last dims of both operands

    @pl.when(k == 0)
    def _init():
        acc_ref[...] = jnp.zeros_like(acc_ref)

    # Pretrained branch partial sum: x @ W^T  (MXU, f32 accumulate).
    acc_ref[...] += lax.dot_general(x_ref[...], w_ref[...], contract_last,
                                    preferred_element_type=jnp.float32)

    # Epilogue: rank-r matmul (all-f32), bias add and the store run once per
    # output tile.
    @pl.when(k == pl.num_programs(2) - 1)
    def _finalize():
        lora = lax.dot_general(xa_ref[...], b_ref[...], contract_last,
                               preferred_element_type=jnp.float32)
        o_ref[...] = (acc_ref[...] + lora + bias_ref[...]).astype(o_ref.dtype)


# --------------------------------------------------------------------------- #
# One-time parameter preparation (hoisted out of the per-call hot path)
# --------------------------------------------------------------------------- #
def prepare_lora_linear_params(weight, bias, lora_A, lora_B, *, r, lora_alpha,
                               compute_dtype=jnp.bfloat16):
    """Cast / pad the frozen weight & bias and fold (alpha/r) into B, once.

    weight : (out_features, in_features)   frozen
    bias   : (out_features,) or None       frozen
    lora_A : (r, in_features)              trainable (kept unpadded, f32)
    lora_B : (out_features, r)             trainable (scaled + padded, f32)

    Do this at model-setup time (re-run cheaply for B/A after optimizer steps
    if training); the large N x K weight is never padded per forward call.
    """
    assert r > 0, "r == 0 / merged LoRA reduces to a plain linear layer"
    N, K = weight.shape
    scaling = lora_alpha / r
    cdt = weight.dtype if compute_dtype is None else compute_dtype

    Np = _round_up(N, 128)
    Kp = _round_up(K, 128)
    # r is padded to a lane-dense 128 so the epilogue MXU op and the B/xa tiles
    # stay full-width vregs; with xa precomputed outside, the extra HBM traffic
    # from this padding is negligible (it only touches the tiny rank-r tensors).
    r_pad = _round_up(r, 128)

    w_p = weight.astype(cdt)
    if (Np, Kp) != (N, K):
        w_p = jnp.pad(w_p, ((0, Np - N), (0, Kp - K)))

    if bias is None:
        bias = jnp.zeros((N,), jnp.float32)
    bias_p = bias.astype(jnp.float32).reshape(1, N)
    if Np != N:
        bias_p = jnp.pad(bias_p, ((0, 0), (0, Np - N)))

    a_f32 = lora_A.astype(jnp.float32)                      # used outside kernel
    b_p = lora_B.astype(jnp.float32) * scaling              # fold alpha/r once
    if (Np, r_pad) != (N, r):
        b_p = jnp.pad(b_p, ((0, Np - N), (0, r_pad - r)))

    meta = dict(N=N, K=K, Np=Np, Kp=Kp, r=r, r_pad=r_pad, compute_dtype=cdt)
    return dict(weight=w_p, bias=bias_p, lora_A=a_f32, lora_B=b_p, meta=meta)


# --------------------------------------------------------------------------- #
# Forward
# --------------------------------------------------------------------------- #
def lora_linear_forward(x, params, *, tm=512, tn=1024, tk=512, out_dtype=None,
                        vmem_limit_bytes=48 * 1024 * 1024):
    """Fused LoRALinear forward using prepared params.

    x : (batch, seq, in_features); returns (batch, seq, out_features).

    Tuning notes (per generation):
      * defaults (tm,tn,tk)=(512,1024,512) use ~9 MiB of double-buffered VMEM
        in bf16 -- safe on v5e / v6e / v7x and close to the HBM roofline.
      * v6e (128 MiB VMEM, worst flops:BW ratio): push to tm=1024, tn=1024-2048,
        tk=1024 in bf16 and raise vmem_limit_bytes toward ~96-110 MiB; keep
        tn/tk multiples of 256 for the 2x256^2 MXU.
      * v7x (64 MiB VMEM, 3.2 TB/s, 2 TCs): keep the double-buffered working
        set <= ~48-56 MiB (bf16 512-1024 x 1024 x 512 is safe); ensure the M or
        N grid has >= 2 tiles so both TensorCores get "parallel" work.  If
        profiling shows exposed DMA at large tn, sweep pipeline_mode=
        pl.Buffered(3) on the x/W BlockSpecs.
      * v5e: prefer a deeper tk (e.g. 1024) to cut the number of k steps
        (fewer (tm,tn) accumulator read-modify-writes on its single vst slot).
    """
    meta = params["meta"]
    N, K, Np, Kp, r_pad = meta["N"], meta["K"], meta["Np"], meta["Kp"], meta["r_pad"]
    cdt = meta["compute_dtype"]

    *lead, K_in = x.shape
    assert K_in == K, f"in_features mismatch: {K_in} vs {K}"
    M = 1
    for d in lead:
        M *= d
    if out_dtype is None:
        out_dtype = x.dtype

    x2d = x.reshape(M, K)

    # Rank-r projection (dropout p=0 -> identity) precomputed once per call:
    # a tiny (M x K x r) f32 matmul, shared across all output-column tiles.
    xa = jnp.dot(x2d.astype(jnp.float32), params["lora_A"].T,
                 preferred_element_type=jnp.float32)

    # Tile selection.  bf16 x/out blocks need >= 16 sublanes.
    sub = 8 if jnp.dtype(cdt).itemsize == 4 else 16
    tm_eff = max(sub, min(tm - tm % sub if tm % sub else tm, _round_up(M, sub)))
    Mp = _round_up(M, tm_eff)
    tn_eff = _pick_tile(tn, Np, 128)
    tk_eff = _pick_tile(tk, Kp, 128)

    # Only the activation (and the tiny xa) are padded per call.
    x_p = x2d.astype(cdt)
    if (Mp, Kp) != (M, K):
        x_p = jnp.pad(x_p, ((0, Mp - M), (0, Kp - K)))
    xa_p = xa
    if (Mp, r_pad) != xa.shape:
        xa_p = jnp.pad(xa, ((0, Mp - M), (0, r_pad - xa.shape[1])))

    grid = (Mp // tm_eff, Np // tn_eff, Kp // tk_eff)

    out2d = pl.pallas_call(
        _lora_linear_kernel,
        out_shape=jax.ShapeDtypeStruct((Mp, Np), out_dtype),
        grid_spec=pltpu.PrefetchScalarGridSpec(
            num_scalar_prefetch=0,
            grid=grid,
            in_specs=[
                pl.BlockSpec((tm_eff, tk_eff), lambda i, j, k: (i, k)),   # x
                pl.BlockSpec((tn_eff, tk_eff), lambda i, j, k: (j, k)),   # W (out, in)
                pl.BlockSpec((tm_eff, r_pad), lambda i, j, k: (i, 0)),    # xa (j/k resident)
                pl.BlockSpec((tn_eff, r_pad), lambda i, j, k: (j, 0)),    # B*scale (k resident)
                pl.BlockSpec((1, tn_eff), lambda i, j, k: (0, j)),        # bias
            ],
            out_specs=pl.BlockSpec((tm_eff, tn_eff), lambda i, j, k: (i, j)),
            scratch_shapes=[pltpu.VMEM((tm_eff, tn_eff), jnp.float32)],
        ),
        compiler_params=pltpu.CompilerParams(
            dimension_semantics=("parallel", "parallel", "arbitrary"),
            vmem_limit_bytes=vmem_limit_bytes,
        ),
    )(x_p, params["weight"], xa_p, params["lora_B"], params["bias"])

    out = out2d
    if Np != N:          # only hit when out_features is not a multiple of 128
        out = out[:, :N]
    if Mp != M:
        out = out[:M]
    return out.reshape(*lead, N)


# --------------------------------------------------------------------------- #
# Self-test
# --------------------------------------------------------------------------- #
if __name__ == "__main__":
    # Module hyper-parameters (small, consistent with the forward pass).
    batch, seq = 2, 8
    in_features, out_features = 32, 64
    r, lora_alpha, lora_dropout = 4, 8, 0.0  # dropout 0.0 -> identity branch
    scaling = lora_alpha / r

    key = jax.random.PRNGKey(0)
    kx, kw, kb, ka, kB = jax.random.split(key, 5)

    # nn.Linear default init: U(-1/sqrt(in), 1/sqrt(in)) for weight and bias.
    lin_bound = 1.0 / math.sqrt(in_features)
    weight = jax.random.uniform(kw, (out_features, in_features),
                                minval=-lin_bound, maxval=lin_bound,
                                dtype=jnp.float32)
    bias = jax.random.uniform(kb, (out_features,),
                              minval=-lin_bound, maxval=lin_bound,
                              dtype=jnp.float32)
    # lora_A: kaiming_uniform_(a=sqrt(5)) -> U(-1/sqrt(in), 1/sqrt(in)).
    lora_A = jax.random.uniform(ka, (r, in_features),
                                minval=-lin_bound, maxval=lin_bound,
                                dtype=jnp.float32)
    # PyTorch inits lora_B to zeros; use small random values so the LoRA path
    # is actually exercised.
    lora_B = 0.01 * jax.random.normal(kB, (out_features, r), dtype=jnp.float32)

    x = jax.random.normal(kx, (batch, seq, in_features), dtype=jnp.float32)
    ref = x @ weight.T + bias + (x @ lora_A.T) @ lora_B.T * scaling

    # 1) Exact f32 path; tiles clamp to the (padded) toy problem -> single-block grid.
    params_f32 = prepare_lora_linear_params(weight, bias, lora_A, lora_B,
                                            r=r, lora_alpha=lora_alpha,
                                            compute_dtype=jnp.float32)
    out = lora_linear_forward(x, params_f32)
    out = jax.block_until_ready(out)
    assert out.shape == (batch, seq, out_features)
    assert jnp.allclose(out, ref, atol=1e-5, rtol=1e-5), "f32 mismatch vs reference"

    # 2) f32 with small explicit tiles on a larger layer -> exercises the real
    #    (M, N, K) grid, the K-reduction accumulator and the k==last epilogue.
    in2, out2, seq2 = 256, 256, 16
    k2x, k2w, k2b, k2a, k2B = jax.random.split(jax.random.PRNGKey(1), 5)
    b2 = 1.0 / math.sqrt(in2)
    w2 = jax.random.uniform(k2w, (out2, in2), minval=-b2, maxval=b2,
                            dtype=jnp.float32)
    bias2 = jax.random.uniform(k2b, (out2,), minval=-b2, maxval=b2,
                               dtype=jnp.float32)
    A2 = jax.random.uniform(k2a, (r, in2), minval=-b2, maxval=b2,
                            dtype=jnp.float32)
    B2 = 0.01 * jax.random.normal(k2B, (out2, r), dtype=jnp.float32)
    x2 = jax.random.normal(k2x, (batch, seq2, in2), dtype=jnp.float32)
    ref2 = x2 @ w2.T + bias2 + (x2 @ A2.T) @ B2.T * scaling
    params2 = prepare_lora_linear_params(w2, bias2, A2, B2,
                                         r=r, lora_alpha=lora_alpha,
                                         compute_dtype=jnp.float32)
    out_tiled = lora_linear_forward(x2, params2, tm=16, tn=128, tk=128)  # grid = (2,2,2)
    out_tiled = jax.block_until_ready(out_tiled)
    assert jnp.allclose(out_tiled, ref2, atol=1e-3, rtol=1e-3), "tiled mismatch"

    # 3) Default bf16 weight/activation streaming with f32 accumulation and an
    #    all-f32 LoRA epilogue (looser tolerance from the bf16 main matmul).
    params_bf16 = prepare_lora_linear_params(weight, bias, lora_A, lora_B,
                                             r=r, lora_alpha=lora_alpha)  # bf16 default
    out_bf16 = lora_linear_forward(x, params_bf16)
    out_bf16 = jax.block_until_ready(out_bf16).astype(jnp.float32)
    assert out_bf16.shape == (batch, seq, out_features)
    assert jnp.allclose(out_bf16, ref, atol=5e-2, rtol=5e-2), "bf16 mismatch"

    print("KERNEL_OK")
</pallas_src>

<mosaic_0001>
module attributes {stable_mosaic.version = 11 : i64} {
  func.func @_lora_linear_kernel(%arg0: i32, %arg1: i32, %arg2: i32, %arg3: memref<16x128xf32, #tpu.memory_space<vmem>>, %arg4: memref<128x128xf32, #tpu.memory_space<vmem>>, %arg5: memref<16x128xf32, #tpu.memory_space<vmem>>, %arg6: memref<128x128xf32, #tpu.memory_space<vmem>>, %arg7: memref<1x128xf32, #tpu.memory_space<vmem>>, %arg8: memref<16x128xf32, #tpu.memory_space<vmem>>, %arg9: memref<16x128xf32, #tpu.memory_space<vmem>>) attributes {dimension_semantics = [#tpu.dimension_semantics<parallel>, #tpu.dimension_semantics<parallel>, #tpu.dimension_semantics<arbitrary>], iteration_bounds = array<i64: 1, 1, 1>, scalar_prefetch = 0 : i64, scratch_operands = 1 : i64, tpu.core_type = #tpu.core_type<tc>, window_params = [{transform_indices = @transform_0, window_bounds = array<i64: 16, 128>}, {transform_indices = @transform_1, window_bounds = array<i64: 128, 128>}, {transform_indices = @transform_2, window_bounds = array<i64: 16, 128>}, {transform_indices = @transform_3, window_bounds = array<i64: 128, 128>}, {transform_indices = @transform_4, window_bounds = array<i64: 1, 128>}, {transform_indices = @transform_5, window_bounds = array<i64: 16, 128>}]} {
    %c0_i32 = arith.constant 0 : i32
    %0 = arith.cmpi eq, %arg2, %c0_i32 : i32
    %1 = arith.extui %0 : i1 to i32
    %c0_i32_0 = arith.constant 0 : i32
    %2 = arith.cmpi ne, %1, %c0_i32_0 : i32
    scf.if %2 {
      %cst_10 = arith.constant 0.000000e+00 : f32
      %12 = vector.broadcast %cst_10 : f32 to vector<16x128xf32>
      %c0_11 = arith.constant 0 : index
      %c0_12 = arith.constant 0 : index
      %13 = vector.load %arg9[%c0_11, %c0_12] : memref<16x128xf32, #tpu.memory_space<vmem>>, vector<16x128xf32>
      tpu.vector_store %arg9[%c0_11, %c0_12], %12 {strides = array<i32>} : memref<16x128xf32, #tpu.memory_space<vmem>>, vector<16x128xf32>,
    } else {
    }
    %c0 = arith.constant 0 : index
    %c0_1 = arith.constant 0 : index
    %3 = vector.load %arg9[%c0, %c0_1] : memref<16x128xf32, #tpu.memory_space<vmem>>, vector<16x128xf32>
    %c0_2 = arith.constant 0 : index
    %c0_3 = arith.constant 0 : index
    %4 = vector.load %arg3[%c0_2, %c0_3] : memref<16x128xf32, #tpu.memory_space<vmem>>, vector<16x128xf32>
    %c0_4 = arith.constant 0 : index
    %c0_5 = arith.constant 0 : index
    %5 = vector.load %arg4[%c0_4, %c0_5] : memref<128x128xf32, #tpu.memory_space<vmem>>, vector<128x128xf32>
    %cst = arith.constant dense<0.000000e+00> : vector<16x128xf32>
    %6 = tpu.matmul %4, %5, %cst {dimension_numbers = #tpu.dot_dimension_numbers<[1], [1], [0], [0], [0, 0, 1, 0], [], []>} : vector<16x128xf32>, vector<128x128xf32>, vector<16x128xf32> -> vector<16x128xf32>
    %7 = arith.addf %3, %6 : vector<16x128xf32>
    %c0_6 = arith.constant 0 : index
    %c0_7 = arith.constant 0 : index
    %8 = vector.load %arg9[%c0_6, %c0_7] : memref<16x128xf32, #tpu.memory_space<vmem>>, vector<16x128xf32>
    tpu.vector_store %arg9[%c0_6, %c0_7], %7 {strides = array<i32>} : memref<16x128xf32, #tpu.memory_space<vmem>>, vector<16x128xf32>,
    %c0_i32_8 = arith.constant 0 : i32
    %9 = arith.cmpi eq, %arg2, %c0_i32_8 : i32
    %10 = arith.extui %9 : i1 to i32
    %c0_i32_9 = arith.constant 0 : i32
    %11 = arith.cmpi ne, %10, %c0_i32_9 : i32
    scf.if %11 {
      %c0_10 = arith.constant 0 : index
      %c0_11 = arith.constant 0 : index
      %12 = vector.load %arg5[%c0_10, %c0_11] : memref<16x128xf32, #tpu.memory_space<vmem>>, vector<16x128xf32>
      %c0_12 = arith.constant 0 : index
      %c0_13 = arith.constant 0 : index
      %13 = vector.load %arg6[%c0_12, %c0_13] : memref<128x128xf32, #tpu.memory_space<vmem>>, vector<128x128xf32>
      %cst_14 = arith.constant dense<0.000000e+00> : vector<16x128xf32>
      %14 = tpu.matmul %12, %13, %cst_14 {dimension_numbers = #tpu.dot_dimension_numbers<[1], [1], [0], [0], [0, 0, 1, 0], [], []>} : vector<16x128xf32>, vector<128x128xf32>, vector<16x128xf32> -> vector<16x128xf32>
      %c0_15 = arith.constant 0 : index
      %c0_16 = arith.constant 0 : index
      %15 = vector.load %arg9[%c0_15, %c0_16] : memref<16x128xf32, #tpu.memory_space<vmem>>, vector<16x128xf32>
      %16 = arith.addf %15, %14 : vector<16x128xf32>
      %c0_17 = arith.constant 0 : index
      %c0_18 = arith.constant 0 : index
      %17 = vector.load %arg7[%c0_17, %c0_18] : memref<1x128xf32, #tpu.memory_space<vmem>>, vector<1x128xf32>
      %18 = vector.broadcast %17 : vector<1x128xf32> to vector<16x128xf32>
      %19 = arith.addf %16, %18 : vector<16x128xf32>
      %c0_19 = arith.constant 0 : index
      %c0_20 = arith.constant 0 : index
      %20 = vector.load %arg8[%c0_19, %c0_20] : memref<16x128xf32, #tpu.memory_space<vmem>>, vector<16x128xf32>
      tpu.vector_store %arg8[%c0_19, %c0_20], %19 {strides = array<i32>} : memref<16x128xf32, #tpu.memory_space<vmem>>, vector<16x128xf32>,
    } else {
    }
    return
  }
  func.func @transform_0(%arg0: i32, %arg1: i32, %arg2: i32) -> (i32, i32) {
    %c0_i32 = arith.constant 0 : i32
    return %arg0, %arg2 : i32, i32
  }
  func.func @transform_1(%arg0: i32, %arg1: i32, %arg2: i32) -> (i32, i32) {
    %c0_i32 = arith.constant 0 : i32
    return %arg1, %arg2 : i32, i32
  }
  func.func @transform_2(%arg0: i32, %arg1: i32, %arg2: i32) -> (i32, i32) {
    %c0_i32 = arith.constant 0 : i32
    %c0_i32_0 = arith.constant 0 : i32
    return %arg0, %c0_i32 : i32, i32
  }
  func.func @transform_3(%arg0: i32, %arg1: i32, %arg2: i32) -> (i32, i32) {
    %c0_i32 = arith.constant 0 : i32
    %c0_i32_0 = arith.constant 0 : i32
    return %arg1, %c0_i32 : i32, i32
  }
  func.func @transform_4(%arg0: i32, %arg1: i32, %arg2: i32) -> (i32, i32) {
    %c0_i32 = arith.constant 0 : i32
    %c0_i32_0 = arith.constant 0 : i32
    return %c0_i32, %arg1 : i32, i32
  }
  func.func @transform_5(%arg0: i32, %arg1: i32, %arg2: i32) -> (i32, i32) {
    %c0_i32 = arith.constant 0 : i32
    return %arg0, %arg1 : i32, i32
  }
}

</mosaic_0001>

<bundles_post_ra>
// kernel: tpu_custom_call.1
= control target key start
LH: loop header
LB: loop body
LE: loop exit
PB: predicated region body
PF: predicated region fallthrough
CT: control target
= control target key end

     0   :  { %10 = vsyncpa [#allocation4], 0  ;;  %s603_s0 = inlined_call_operand.hbm [shape: f32[16,128], index: 0, kind: input, shape index: {}]   ;;  %s604_s1 = inlined_call_operand.hbm [shape: f32[128,128], index: 1, kind: input, shape index: {}]   ;;  %s605_s2 = inlined_call_operand.hbm [shape: f32[16,128], index: 2, kind: input, shape index: {}]   ;;  %s606_s3 = inlined_call_operand.hbm [shape: f32[128,128], index: 3, kind: input, shape index: {}]   ;;  %s607_s4 = inlined_call_operand.vmem [shape: f32[1,128], index: 4, kind: input, shape index: {}]   ;;  %s608_s5 = inlined_call_operand.hbm [shape: f32[16,128], index: 5, kind: output, shape index: {}]  }
   0x1   :  { %11 = vsyncpa [#allocation7], 0 }
   0x2   :  { %12 = vsyncpa [#allocation10], 0 }
   0x3   :  { %13 = vsyncpa [#allocation5], 0  ;;  %s533_s18 = smov [#allocation6]   ;;  %s534_s20 = smov [#allocation3]  }
   0x4   :  { %s31_s19 = sshll.u32 %s533_s18, 4  ;;  %s19_s21 = sshll.u32 %s534_s20, 4  ;;  %s32_s19 = int_to_ptr.vmem [resolvable:$true] %s31_s19  ;;  %s20_s21 = int_to_ptr.vmem [resolvable:$true] %s19_s21 }
   0x5   :  { %s433_s22 = scalar_lea.vmem %s32_s19, 2048  ;;  %p438_p1 = scmp.lt.s32.totalorder %s32_s19, %s32_s19 }
   0x6   :  { %p434_p0 = scmp.ne.s32.totalorder %s32_s19, %s433_s22  ;;  %p439_p2 = scmp.lt.s32.totalorder %s433_s22, %s433_s22 }
   0x8   :  { %p440_p3 = por %p439_p2, %p438_p1 }
   0xa   :  { %p441_p4 = pnand %p440_p3, %p434_p0 }
   0xc   :  { %444 = shalt.err (!%p441_p4)
}
   0xd   :  { %s535_s23 = smov 128   ;;  %s536_s24 = smov 8  }
   0xe   :  { %37 = dma.hbm_to_vmem [thread:$0]  %s604_s1, 2048, %s32_s19, [#allocation7], %s535_s23, %s535_s23, %s536_s24  }
   0xf   :  { %s453_s27 = scalar_lea.vmem %s20_s21, 256  ;;  %p458_p6 = scmp.lt.s32.totalorder %s20_s21, %s20_s21 }
  0x10   :  { %p454_p5 = scmp.ne.s32.totalorder %s20_s21, %s453_s27  ;;  %p459_p7 = scmp.lt.s32.totalorder %s453_s27, %s453_s27 }
  0x12   :  { %p460_p8 = por %p459_p7, %p458_p6 }
  0x14   :  { %p461_p9 = pnand %p460_p8, %p454_p5 }
  0x16   :  { %464 = shalt.err (!%p461_p9)
}
  0x17   :  { %25 = dma.hbm_to_vmem [thread:$0]  %s603_s0, 256, %s20_s21, [#allocation4], %s535_s23, %s535_s23, %s536_s24  }
  0x18   :  { %s537_s30 = smov [#allocation8]   ;;  %s538_s7 = smov [#allocation9]  }
  0x19   :  { %s43_s6 = sshll.u32 %s537_s30, 4  ;;  %s55_s8 = sshll.u32 %s538_s7, 4  ;;  %s44_s6 = int_to_ptr.vmem [resolvable:$true] %s43_s6  ;;  %s56_s8 = int_to_ptr.vmem [resolvable:$true] %s55_s8 }
  0x1a   :  { %s473_s1 = scalar_lea.vmem %s44_s6, 256  ;;  %p478_p11 = scmp.lt.s32.totalorder %s44_s6, %s44_s6 }
  0x1b   :  { %p474_p10 = scmp.ne.s32.totalorder %s44_s6, %s473_s1  ;;  %p479_p12 = scmp.lt.s32.totalorder %s473_s1, %s473_s1 }
  0x1d   :  { %p480_p13 = por %p479_p12, %p478_p11 }
  0x1f   :  { %p481_p0 = pnand %p480_p13, %p474_p10 }
  0x21   :  { %484 = shalt.err (!%p481_p0)
}
  0x22   :  { %49 = dma.hbm_to_vmem [thread:$0]  %s605_s2, 256, %s44_s6, [#allocation7], %s535_s23, %s535_s23, %s536_s24  }
  0x23   :  { %s493_s0 = scalar_lea.vmem %s56_s8, 2048  ;;  %p498_p2 = scmp.lt.s32.totalorder %s56_s8, %s56_s8 }
  0x24   :  { %p494_p1 = scmp.ne.s32.totalorder %s56_s8, %s493_s0  ;;  %p499_p3 = scmp.lt.s32.totalorder %s493_s0, %s493_s0 }
  0x26   :  { %p500_p4 = por %p499_p3, %p498_p2 }
  0x28   :  { %p501_p5 = pnand %p500_p4, %p494_p1 }
  0x2a   :  { %504 = shalt.err (!%p501_p5)
}
  0x2b   :  { %61 = dma.hbm_to_vmem [thread:$0]  %s606_s3, 2048, %s56_s8, [#allocation10], %s535_s23, %s535_s23, %s536_s24  }
  0x2c   :  { %525 = dma.done.wait [#allocation4], 256  }
  0x2d   :  { %526 = vsyncadd [#allocation4], 4294967040 }
  0x2e   :  { %527 = dma.done.wait [#allocation7], 2304  }
  0x2f   :  { %528 = vsyncadd [#allocation7], 4294964992 }
  0x30   :  { %529 = dma.done.wait [#allocation10], 2048  }
  0x31   :  { %530 = vsyncadd [#allocation10], 4294965248  ;;  %v101_v0 = vld [vmem:[#allocation6 + $0x78] sm:$0xff]  ;;  %v201_v1 = vld [vmem:[#allocation9 + $0x78] sm:$0xff]  ;;  %s539_s13 = smov [#allocation11]  }
  0x32   :  { %v100_v2 = vld [vmem:[#allocation6 + $0x70] sm:$0xff]  ;;  %348 = vmatprep.subr.mxu0 %v101_v0  ;;  %383 = vmatprep.subr.mxu1 %v201_v1  ;;  %v200_v3 = vld [vmem:[#allocation9 + $0x70] sm:$0xff]  ;;  %v99_v4 = vld [vmem:[#allocation6 + $0x68] sm:$0xff]  ;;  %s297_s14 = sshll.u32 %s539_s13, 4  ;;  %s298_s14 = int_to_ptr.vmem [resolvable:$true] %s297_s14 }
  0x33   :  { %349 = vmatpush3.xpose.msra.mxu0 %v101_v0  ;;  %384 = vmatpush3.xpose.msra.mxu1 %v201_v1  ;;  %v199_v5 = vld [vmem:[#allocation9 + $0x68] sm:$0xff]  ;;  %v98_v6 = vld [vmem:[#allocation6 + $0x60] sm:$0xff]  ;;  %v198_v7 = vld [vmem:[#allocation9 + $0x60] sm:$0xff]  ;;  %s505_s15 = scalar_lea.vmem %s298_s14, 256  ;;  %p510_p7 = scmp.lt.s32.totalorder %s298_s14, %s298_s14 }
  0x34   :  { %350 = vmatprep.subr.mxu0 %v100_v2  ;;  %385 = vmatprep.subr.mxu1 %v200_v3  ;;  %v84_v8 = vld [vmem:[#allocation3] sm:$0xff]  ;;  %v184_v9 = vld [vmem:[#allocation8] sm:$0xff]  ;;  %v97_v10 = vld [vmem:[#allocation6 + $0x58] sm:$0xff]  ;;  %p506_p6 = scmp.ne.s32.totalorder %s298_s14, %s505_s15  ;;  %p511_p8 = scmp.lt.s32.totalorder %s505_s15, %s505_s15 }
  0x35   :  { %v197_v11 = vld [vmem:[#allocation9 + $0x58] sm:$0xff]  ;;  %380 = vmatprep.mubr.f32.mxu0 %v84_v8  ;;  %415 = vmatprep.mubr.f32.mxu1 %v184_v9  ;;  %v96_v12 = vld [vmem:[#allocation6 + $0x50] sm:$0xff]  ;;  %v196_v13 = vld [vmem:[#allocation9 + $0x50] sm:$0xff] }
  0x36   :  { %v95_v14 = vld [vmem:[#allocation6 + $0x48] sm:$0xff]  ;;  %v195_v15 = vld [vmem:[#allocation9 + $0x48] sm:$0xff]  ;;  %v94_v16 = vld [vmem:[#allocation6 + $0x40] sm:$0xff]  ;;  %p512_p9 = por %p511_p8, %p510_p7 }
  0x37   :  { %351 = vmatpush3.xpose.msra.mxu0 %v100_v2  ;;  %386 = vmatpush3.xpose.msra.mxu1 %v200_v3  ;;  %v194_v17 = vld [vmem:[#allocation9 + $0x40] sm:$0xff]  ;;  %v93_v18 = vld [vmem:[#allocation6 + $0x38] sm:$0xff]  ;;  %v193_v19 = vld [vmem:[#allocation9 + $0x38] sm:$0xff] }
  0x38   :  { %352 = vmatprep.subr.mxu0 %v99_v4  ;;  %387 = vmatprep.subr.mxu1 %v199_v5  ;;  %v92_v20 = vld [vmem:[#allocation6 + $0x30] sm:$0xff]  ;;  %v192_v21 = vld [vmem:[#allocation9 + $0x30] sm:$0xff]  ;;  %v91_v22 = vld [vmem:[#allocation6 + $0x28] sm:$0xff]  ;;  %p513_p10 = pnand %p512_p9, %p506_p6 }
  0x39   :  { %v191_v23 = vld [vmem:[#allocation9 + $0x28] sm:$0xff]  ;;  %v90_v24 = vld [vmem:[#allocation6 + $0x20] sm:$0xff]  ;;  %v190_v25 = vld [vmem:[#allocation9 + $0x20] sm:$0xff] }
  0x3a   :  { %v89_v26 = vld [vmem:[#allocation6 + $0x18] sm:$0xff]  ;;  %v189_v27 = vld [vmem:[#allocation9 + $0x18] sm:$0xff]  ;;  %v88_v28 = vld [vmem:[#allocation6 + $0x10] sm:$0xff] }
  0x3b   :  { %353 = vmatpush3.xpose.msra.mxu0 %v99_v4  ;;  %388 = vmatpush3.xpose.msra.mxu1 %v199_v5  ;;  %v188_v29 = vld [vmem:[#allocation9 + $0x10] sm:$0xff]  ;;  %v87_v30 = vld [vmem:[#allocation6 + $0x8] sm:$0xff]  ;;  %v187_v31 = vld [vmem:[#allocation9 + $0x8] sm:$0xff] }
  0x3c   :  { %354 = vmatprep.subr.mxu0 %v98_v6  ;;  %389 = vmatprep.subr.mxu1 %v198_v7  ;;  %v86_v32 = vld [vmem:[#allocation6] sm:$0xff]  ;;  %v186_v33 = vld [vmem:[#allocation9] sm:$0xff]  ;;  %v85_v34 = vld [vmem:[#allocation3 + $0x8] sm:$0xff] }
  0x3d   :  { %v185_v35 = vld [vmem:[#allocation8 + $0x8] sm:$0xff]  ;;  %v311_v38 = vld [vmem:[%s607_s4] ss:$0 sm:$0xff] }
  0x3f   :  { %355 = vmatpush3.xpose.msra.mxu0 %v98_v6  ;;  %390 = vmatpush3.xpose.msra.mxu1 %v198_v7 }
  0x40   :  { %356 = vmatprep.subr.mxu0 %v97_v10  ;;  %391 = vmatprep.subr.mxu1 %v197_v11 }
  0x43   :  { %357 = vmatpush3.xpose.msra.mxu0 %v97_v10  ;;  %392 = vmatpush3.xpose.msra.mxu1 %v197_v11 }
  0x44   :  { %358 = vmatprep.subr.mxu0 %v96_v12  ;;  %393 = vmatprep.subr.mxu1 %v196_v13 }
  0x47   :  { %359 = vmatpush3.xpose.msra.mxu0 %v96_v12  ;;  %394 = vmatpush3.xpose.msra.mxu1 %v196_v13 }
  0x48   :  { %360 = vmatprep.subr.mxu0 %v95_v14  ;;  %395 = vmatprep.subr.mxu1 %v195_v15 }
  0x4b   :  { %361 = vmatpush3.xpose.msra.mxu0 %v95_v14  ;;  %396 = vmatpush3.xpose.msra.mxu1 %v195_v15 }
  0x4c   :  { %362 = vmatprep.subr.mxu0 %v94_v16  ;;  %397 = vmatprep.subr.mxu1 %v194_v17 }
  0x4f   :  { %363 = vmatpush3.xpose.msra.mxu0 %v94_v16  ;;  %398 = vmatpush3.xpose.msra.mxu1 %v194_v17 }
  0x50   :  { %364 = vmatprep.subr.mxu0 %v93_v18  ;;  %399 = vmatprep.subr.mxu1 %v193_v19 }
  0x53   :  { %365 = vmatpush3.xpose.msra.mxu0 %v93_v18  ;;  %400 = vmatpush3.xpose.msra.mxu1 %v193_v19 }
  0x54   :  { %366 = vmatprep.subr.mxu0 %v92_v20  ;;  %401 = vmatprep.subr.mxu1 %v192_v21 }
  0x57   :  { %367 = vmatpush3.xpose.msra.mxu0 %v92_v20  ;;  %402 = vmatpush3.xpose.msra.mxu1 %v192_v21 }
  0x58   :  { %368 = vmatprep.subr.mxu0 %v91_v22  ;;  %403 = vmatprep.subr.mxu1 %v191_v23 }
  0x5b   :  { %369 = vmatpush3.xpose.msra.mxu0 %v91_v22  ;;  %404 = vmatpush3.xpose.msra.mxu1 %v191_v23 }
  0x5c   :  { %370 = vmatprep.subr.mxu0 %v90_v24  ;;  %405 = vmatprep.subr.mxu1 %v190_v25 }
  0x5f   :  { %371 = vmatpush3.xpose.msra.mxu0 %v90_v24  ;;  %406 = vmatpush3.xpose.msra.mxu1 %v190_v25 }
  0x60   :  { %372 = vmatprep.subr.mxu0 %v89_v26  ;;  %407 = vmatprep.subr.mxu1 %v189_v27 }
  0x63   :  { %373 = vmatpush3.xpose.msra.mxu0 %v89_v26  ;;  %408 = vmatpush3.xpose.msra.mxu1 %v189_v27 }
  0x64   :  { %374 = vmatprep.subr.mxu0 %v88_v28  ;;  %409 = vmatprep.subr.mxu1 %v188_v29 }
  0x67   :  { %375 = vmatpush3.xpose.msra.mxu0 %v88_v28  ;;  %410 = vmatpush3.xpose.msra.mxu1 %v188_v29 }
  0x68   :  { %376 = vmatprep.subr.mxu0 %v87_v30  ;;  %411 = vmatprep.subr.mxu1 %v187_v31 }
  0x6b   :  { %377 = vmatpush3.xpose.msra.mxu0 %v87_v30  ;;  %412 = vmatpush3.xpose.msra.mxu1 %v187_v31 }
  0x6c   :  { %378 = vmatprep.subr.mxu0 %v86_v32  ;;  %413 = vmatprep.subr.mxu1 %v186_v33 }
  0x6f   :  { %379 = vmatpush3.xpose.msra.mxu0 %v86_v32  ;;  %414 = vmatpush3.xpose.msra.mxu1 %v186_v33 }
  0x72   :  { %381 = vmatmul.mubr.f32.vlgmr.msra.gmra.mxu0 %v85_v34  ;;  %416 = vmatmul.mubr.f32.vlgmr.msra.gmra.mxu1 %v185_v35 }
 0x132   :  { %v382_v36 = vpop.f32.mrf.mxu0  ;;  %v417_v37 = vpop.f32.mrf.mxu1 }
 0x133   :  { %v280_v39 = vadd.f32 %v417_v37, %v382_v36 }
 0x134   :  { %v168_v40 = vpop.f32.mrf.mxu0  ;;  %v268_v41 = vpop.f32.mrf.mxu1 }
 0x135   :  { %v289_v42 = vadd.f32 %v311_v38, %v280_v39  ;;  %v279_v43 = vadd.f32 %v268_v41, %v168_v40 }
 0x137   :  { %291 = vst [vmem:[#allocation11 + $0x8] sm:$0xff] %v289_v42  ;;  %v288_v44 = vadd.f32 %v311_v38, %v279_v43 }
 0x139   :  { %290 = vst [vmem:[#allocation11] sm:$0xff] %v288_v44 }
 0x13a   :  { %516 = shalt.err (!%p513_p10)
}
 0x13b   :  { %303 = dma.vmem_to_hbm [thread:$0]  %s298_s14, 256, %s608_s5, [#allocation5], %s535_s23, %s535_s23, %s536_s24  }
 0x13c   :  { %531 = dma.done.wait [#allocation5], 256  }
 0x13d   :  { %532 = vsyncadd [#allocation5], 4294967040 }
 0x13e   :  { %307 = vsyncpa [#allocation4], 1 }
 0x13f   :  { %308 = vsyncpa [#allocation7], 1 }
 0x140   :  { %309 = vsyncpa [#allocation10], 1 }
 0x141   :  { %310 = vsyncpa [#allocation5], 1 }

</bundles_post_ra>
